<compile_context>
chip_gen: v6e
topology: v6e:2x2x1
jax: 0.10.0
libtpu: 0.0.40
codegen_flags: <defaults>
</compile_context>

<pallas_src>
import jax
import jax.numpy as jnp
from jax.experimental import pallas as pl
from jax.experimental.pallas import tpu as pltpu


def _round_up(n, m):
    return ((n + m - 1) // m) * m


# -----------------------------------------------------------------------------
# Single-step kernel (one LSTM cell step + FC head).
# -----------------------------------------------------------------------------
def _decoder_lstm_step_kernel(xh_ref, c_ref, w_ref, b_ref, wfc_ref, bfc_ref,
                              pred_ref, state_ref):
    B, H = c_ref.shape

    # Single fused gate matmul on the MXU: (B, Din+H) @ (Din+H, 4H), f32 accum.
    xh = xh_ref[...].astype(jnp.bfloat16)
    gates = jnp.dot(xh, w_ref[...], preferred_element_type=jnp.float32) + b_ref[...]

    i_g = jax.nn.sigmoid(gates[:, 0 * H:1 * H])
    f_g = jax.nn.sigmoid(gates[:, 1 * H:2 * H])
    g_g = jnp.tanh(gates[:, 2 * H:3 * H])
    o_g = jax.nn.sigmoid(gates[:, 3 * H:4 * H])

    c_new = f_g * c_ref[...] + i_g * g_g
    h_new = o_g * jnp.tanh(c_new)

    # Output projection: (B, H) @ (H, V) + b, f32 accumulation.
    pred = (jnp.dot(h_new.astype(jnp.bfloat16), wfc_ref[...],
                    preferred_element_type=jnp.float32) + bfc_ref[...])
    pred_ref[...] = pred.astype(pred_ref.dtype)

    # Lane-dense packed state output: [h' | c' | zero pad] -> one dense store.
    pad = state_ref.shape[-1] - 2 * H
    parts = [h_new, c_new]
    if pad:
        parts.append(jnp.zeros((B, pad), jnp.float32))
    state_ref[...] = jnp.concatenate(parts, axis=1).astype(state_ref.dtype)


def decoder_lstm_no_attention(input_seq, hidden, cell, encoder_outputs, params):
    """One decoder step. `encoder_outputs` is ignored (as in the PyTorch module)."""
    del encoder_outputs  # unused by the reference module
    B = input_seq.shape[0]
    H = hidden.shape[-1]
    V = params["b_fc"].shape[-1]
    S = _round_up(2 * H, 128)  # lane-dense packed [h', c'] slab width

    # Concatenate [x, h] once in the wrapper -> single fused gate matmul operand.
    xh = jnp.concatenate([input_seq, hidden], axis=1)

    vmem = pl.BlockSpec(memory_space=pltpu.MemorySpace.VMEM)
    pred, state = pl.pallas_call(
        _decoder_lstm_step_kernel,
        out_shape=(
            jax.ShapeDtypeStruct((B, V), jnp.float32),
            jax.ShapeDtypeStruct((B, S), jnp.float32),
        ),
        in_specs=[vmem] * 6,
        out_specs=(vmem, vmem),
    )(xh, cell, params["w_cat"], params["b_cat"], params["w_fc_t"], params["b_fc"])

    return pred, None, state[:, :H], state[:, H:2 * H]


# -----------------------------------------------------------------------------
# Multi-step (teacher-forced) decode kernel: weights stay resident in VMEM
# across the timestep grid axis; h/c carried in VMEM scratch.
# -----------------------------------------------------------------------------
def _decoder_lstm_loop_kernel(x_ref, h0_ref, c0_ref, w_ref, b_ref, wfc_ref, bfc_ref,
                              pred_ref, state_ref, h_sc, c_sc):
    t = pl.program_id(0)
    B, H = c_sc.shape

    @pl.when(t == 0)
    def _():
        h_sc[...] = h0_ref[...]
        c_sc[...] = c0_ref[...]

    xh = jnp.concatenate([x_ref[0], h_sc[...]], axis=1).astype(jnp.bfloat16)
    gates = jnp.dot(xh, w_ref[...], preferred_element_type=jnp.float32) + b_ref[...]

    i_g = jax.nn.sigmoid(gates[:, 0 * H:1 * H])
    f_g = jax.nn.sigmoid(gates[:, 1 * H:2 * H])
    g_g = jnp.tanh(gates[:, 2 * H:3 * H])
    o_g = jax.nn.sigmoid(gates[:, 3 * H:4 * H])

    c_new = f_g * c_sc[...] + i_g * g_g
    h_new = o_g * jnp.tanh(c_new)
    h_sc[...] = h_new
    c_sc[...] = c_new

    pred = (jnp.dot(h_new.astype(jnp.bfloat16), wfc_ref[...],
                    preferred_element_type=jnp.float32) + bfc_ref[...])
    pred_ref[0] = pred.astype(pred_ref.dtype)

    @pl.when(t == pl.num_programs(0) - 1)
    def _():
        pad = state_ref.shape[-1] - 2 * H
        parts = [h_new, c_new]
        if pad:
            parts.append(jnp.zeros((B, pad), jnp.float32))
        state_ref[...] = jnp.concatenate(parts, axis=1).astype(state_ref.dtype)


def decoder_lstm_decode_sequence(x_seq, h0, c0, params):
    """Run T decoder steps (teacher forced) in ONE pallas_call.

    Weights are DMA'd into VMEM once (constant index_map) and stay resident;
    h/c are carried across timesteps in VMEM scratch.
    Returns (predictions [T,B,V], h_T [B,H], c_T [B,H]).
    """
    T, B, Din = x_seq.shape
    H = h0.shape[-1]
    V = params["b_fc"].shape[-1]
    G = 4 * H
    S = _round_up(2 * H, 128)

    preds, state = pl.pallas_call(
        _decoder_lstm_loop_kernel,
        out_shape=(
            jax.ShapeDtypeStruct((T, B, V), jnp.float32),
            jax.ShapeDtypeStruct((B, S), jnp.float32),
        ),
        grid_spec=pltpu.PrefetchScalarGridSpec(
            num_scalar_prefetch=0,
            grid=(T,),
            in_specs=[
                pl.BlockSpec((1, B, Din), lambda t: (t, 0, 0)),   # x_t (streamed)
                pl.BlockSpec((B, H), lambda t: (0, 0)),           # h0 (resident)
                pl.BlockSpec((B, H), lambda t: (0, 0)),           # c0 (resident)
                pl.BlockSpec((Din + H, G), lambda t: (0, 0)),     # W_cat (resident)
                pl.BlockSpec((1, G), lambda t: (0, 0)),           # b_cat (resident)
                pl.BlockSpec((H, V), lambda t: (0, 0)),           # W_fc  (resident)
                pl.BlockSpec((1, V), lambda t: (0, 0)),           # b_fc  (resident)
            ],
            out_specs=[
                pl.BlockSpec((1, B, V), lambda t: (t, 0, 0)),     # per-step prediction
                pl.BlockSpec((B, S), lambda t: (0, 0)),           # packed [h_T, c_T]
            ],
            scratch_shapes=[pltpu.VMEM((B, H), jnp.float32),
                            pltpu.VMEM((B, H), jnp.float32)],
        ),
        compiler_params=pltpu.CompilerParams(dimension_semantics=("arbitrary",)),
    )(x_seq, h0, c0, params["w_cat"], params["b_cat"],
      params["w_fc_t"], params["b_fc"])

    return preds, state[:, :H], state[:, H:2 * H]


# -----------------------------------------------------------------------------
# Parameters (matching the PyTorch module's shapes, pre-fused / pre-transposed).
# -----------------------------------------------------------------------------
def init_params(key, vocab_len, dec_hid_dim, bidir=True, gnn_dims=-1):
    lstm_input_dim = 2 * dec_hid_dim if bidir else dec_hid_dim
    lstm_hd = dec_hid_dim + gnn_dims if gnn_dims != -1 else dec_hid_dim

    k = jax.random.split(key, 6)
    s = 1.0 / jnp.sqrt(lstm_hd)
    # PyTorch stores W_ih: (4H, Din), W_hh: (4H, H). We keep them transposed and
    # stacked into one (Din+H, 4H) matrix; biases are folded into one.
    w_ih_t = jax.random.uniform(k[0], (lstm_input_dim, 4 * lstm_hd), jnp.float32, -s, s)
    w_hh_t = jax.random.uniform(k[1], (lstm_hd, 4 * lstm_hd), jnp.float32, -s, s)
    b_ih = jax.random.uniform(k[2], (1, 4 * lstm_hd), jnp.float32, -s, s)
    b_hh = jax.random.uniform(k[3], (1, 4 * lstm_hd), jnp.float32, -s, s)
    sf = 1.0 / jnp.sqrt(lstm_hd)
    w_fc_t = jax.random.uniform(k[4], (lstm_hd, vocab_len), jnp.float32, -sf, sf)
    b_fc = jax.random.uniform(k[5], (1, vocab_len), jnp.float32, -sf, sf)

    return {
        # bf16 weights: halves weight DMA bytes, native MXU path (f32 accumulate).
        "w_cat": jnp.concatenate([w_ih_t, w_hh_t], axis=0).astype(jnp.bfloat16),
        "b_cat": (b_ih + b_hh).astype(jnp.float32),
        "w_fc_t": w_fc_t.astype(jnp.bfloat16),
        "b_fc": b_fc.astype(jnp.float32),
    }


# -----------------------------------------------------------------------------
# Pure-JAX reference (uses the same bf16-rounded weights, f32 math).
# -----------------------------------------------------------------------------
def _reference_step(x, h, c, p):
    w = p["w_cat"].astype(jnp.float32)
    wfc = p["w_fc_t"].astype(jnp.float32)
    gates = jnp.concatenate([x, h], axis=1) @ w + p["b_cat"]
    H = h.shape[-1]
    i = jax.nn.sigmoid(gates[:, :H])
    f = jax.nn.sigmoid(gates[:, H:2 * H])
    g = jnp.tanh(gates[:, 2 * H:3 * H])
    o = jax.nn.sigmoid(gates[:, 3 * H:])
    c_new = f * c + i * g
    h_new = o * jnp.tanh(c_new)
    pred = h_new @ wfc + p["b_fc"]
    return pred, h_new, c_new


if __name__ == "__main__":
    vocab_len = 128
    dec_hid_dim = 32       # -> lstm_hd = 32, lstm_input_dim = 64 (bidir=True)
    batch = 8
    src_len = 8
    T = 6                  # timesteps for the resident-weight decode kernel

    key = jax.random.PRNGKey(0)
    kp, kx, kh, kc, ke, ks = jax.random.split(key, 6)

    params = init_params(kp, vocab_len, dec_hid_dim, bidir=True, gnn_dims=-1)

    input_seq = jax.random.normal(kx, (batch, 2 * dec_hid_dim), jnp.float32)
    hidden = jax.random.normal(kh, (batch, dec_hid_dim), jnp.float32)
    cell = jax.random.normal(kc, (batch, dec_hid_dim), jnp.float32)
    # encoder_outputs is accepted but unused by the module's forward.
    encoder_outputs = jax.random.normal(ke, (src_len, batch, 2 * dec_hid_dim),
                                        jnp.float32)

    # ---- single step (matches the PyTorch forward) ----
    pred, attn, h_new, c_new = decoder_lstm_no_attention(
        input_seq, hidden, cell, encoder_outputs, params)
    jax.block_until_ready((pred, h_new, c_new))

    pred_r, h_r, c_r = _reference_step(input_seq, hidden, cell, params)
    assert attn is None
    assert jnp.allclose(pred, pred_r, atol=2e-2, rtol=2e-2)
    assert jnp.allclose(h_new, h_r, atol=2e-2, rtol=2e-2)
    assert jnp.allclose(c_new, c_r, atol=2e-2, rtol=2e-2)

    # ---- multi-step decode with weights resident in VMEM ----
    x_seq = jax.random.normal(ks, (T, batch, 2 * dec_hid_dim), jnp.float32)
    preds, h_T, c_T = decoder_lstm_decode_sequence(x_seq, hidden, cell, params)
    jax.block_until_ready((preds, h_T, c_T))

    h_cur, c_cur = hidden, cell
    preds_ref = []
    for t in range(T):
        p_t, h_cur, c_cur = _reference_step(x_seq[t], h_cur, c_cur, params)
        preds_ref.append(p_t)
    preds_ref = jnp.stack(preds_ref, axis=0)
    assert jnp.allclose(preds, preds_ref, atol=2e-2, rtol=2e-2)
    assert jnp.allclose(h_T, h_cur, atol=2e-2, rtol=2e-2)
    assert jnp.allclose(c_T, c_cur, atol=2e-2, rtol=2e-2)

    print("KERNEL_OK")
</pallas_src>

<mosaic_0001>
module attributes {stable_mosaic.version = 11 : i64} {
  func.func @_decoder_lstm_step_kernel(%arg0: memref<8x96xf32, #tpu.memory_space<vmem>>, %arg1: memref<8x32xf32, #tpu.memory_space<vmem>>, %arg2: memref<96x128xbf16, #tpu.memory_space<vmem>>, %arg3: memref<1x128xf32, #tpu.memory_space<vmem>>, %arg4: memref<32x128xbf16, #tpu.memory_space<vmem>>, %arg5: memref<1x128xf32, #tpu.memory_space<vmem>>, %arg6: memref<8x128xf32, #tpu.memory_space<vmem>>, %arg7: memref<8x128xf32, #tpu.memory_space<vmem>>) attributes {dimension_semantics = [], scalar_prefetch = 0 : i64, scratch_operands = 0 : i64, tpu.core_type = #tpu.core_type<tc>} {
    %c0 = arith.constant 0 : index
    %c0_0 = arith.constant 0 : index
    %0 = vector.load %arg0[%c0, %c0_0] : memref<8x96xf32, #tpu.memory_space<vmem>>, vector<8x96xf32>
    %1 = arith.truncf %0 : vector<8x96xf32> to vector<8x96xbf16>
    %c0_1 = arith.constant 0 : index
    %c0_2 = arith.constant 0 : index
    %2 = vector.load %arg2[%c0_1, %c0_2] : memref<96x128xbf16, #tpu.memory_space<vmem>>, vector<96x128xbf16>
    %cst = arith.constant dense<0.000000e+00> : vector<8x128xf32>
    %3 = tpu.matmul %1, %2, %cst {dimension_numbers = #tpu.dot_dimension_numbers<[1], [0], [0], [1], [0, 0, 1, 1], [], []>} : vector<8x96xbf16>, vector<96x128xbf16>, vector<8x128xf32> -> vector<8x128xf32>
    %c0_3 = arith.constant 0 : index
    %c0_4 = arith.constant 0 : index
    %4 = vector.load %arg3[%c0_3, %c0_4] : memref<1x128xf32, #tpu.memory_space<vmem>>, vector<1x128xf32>
    %5 = vector.broadcast %4 : vector<1x128xf32> to vector<8x128xf32>
    %6 = arith.addf %3, %5 : vector<8x128xf32>
    %7 = vector.extract_strided_slice %6 {offsets = [0, 0], sizes = [8, 32], strides = [1, 1]} : vector<8x128xf32> to vector<8x32xf32>
    %8 = arith.negf %7 : vector<8x32xf32>
    %9 = math.exp %8 : vector<8x32xf32>
    %cst_5 = arith.constant 1.000000e+00 : f32
    %10 = vector.broadcast %cst_5 : f32 to vector<8x32xf32>
    %11 = arith.addf %10, %9 : vector<8x32xf32>
    %12 = arith.divf %10, %11 : vector<8x32xf32>
    %13 = vector.extract_strided_slice %6 {offsets = [0, 32], sizes = [8, 32], strides = [1, 1]} : vector<8x128xf32> to vector<8x32xf32>
    %14 = arith.negf %13 : vector<8x32xf32>
    %15 = math.exp %14 : vector<8x32xf32>
    %cst_6 = arith.constant 1.000000e+00 : f32
    %16 = vector.broadcast %cst_6 : f32 to vector<8x32xf32>
    %17 = arith.addf %16, %15 : vector<8x32xf32>
    %18 = arith.divf %16, %17 : vector<8x32xf32>
    %19 = vector.extract_strided_slice %6 {offsets = [0, 64], sizes = [8, 32], strides = [1, 1]} : vector<8x128xf32> to vector<8x32xf32>
    %20 = math.tanh %19 : vector<8x32xf32>
    %21 = vector.extract_strided_slice %6 {offsets = [0, 96], sizes = [8, 32], strides = [1, 1]} : vector<8x128xf32> to vector<8x32xf32>
    %22 = arith.negf %21 : vector<8x32xf32>
    %23 = math.exp %22 : vector<8x32xf32>
    %cst_7 = arith.constant 1.000000e+00 : f32
    %24 = vector.broadcast %cst_7 : f32 to vector<8x32xf32>
    %25 = arith.addf %24, %23 : vector<8x32xf32>
    %26 = arith.divf %24, %25 : vector<8x32xf32>
    %c0_8 = arith.constant 0 : index
    %c0_9 = arith.constant 0 : index
    %27 = vector.load %arg1[%c0_8, %c0_9] : memref<8x32xf32, #tpu.memory_space<vmem>>, vector<8x32xf32>
    %28 = arith.mulf %18, %27 : vector<8x32xf32>
    %29 = arith.mulf %12, %20 : vector<8x32xf32>
    %30 = arith.addf %28, %29 : vector<8x32xf32>
    %31 = math.tanh %30 : vector<8x32xf32>
    %32 = arith.mulf %26, %31 : vector<8x32xf32>
    %33 = arith.truncf %32 : vector<8x32xf32> to vector<8x32xbf16>
    %c0_10 = arith.constant 0 : index
    %c0_11 = arith.constant 0 : index
    %34 = vector.load %arg4[%c0_10, %c0_11] : memref<32x128xbf16, #tpu.memory_space<vmem>>, vector<32x128xbf16>
    %cst_12 = arith.constant dense<0.000000e+00> : vector<8x128xf32>
    %35 = tpu.matmul %33, %34, %cst_12 {dimension_numbers = #tpu.dot_dimension_numbers<[1], [0], [0], [1], [0, 0, 1, 1], [], []>} : vector<8x32xbf16>, vector<32x128xbf16>, vector<8x128xf32> -> vector<8x128xf32>
    %c0_13 = arith.constant 0 : index
    %c0_14 = arith.constant 0 : index
    %36 = vector.load %arg5[%c0_13, %c0_14] : memref<1x128xf32, #tpu.memory_space<vmem>>, vector<1x128xf32>
    %37 = vector.broadcast %36 : vector<1x128xf32> to vector<8x128xf32>
    %38 = arith.addf %35, %37 : vector<8x128xf32>
    %c0_15 = arith.constant 0 : index
    %c0_16 = arith.constant 0 : index
    %39 = vector.load %arg6[%c0_15, %c0_16] : memref<8x128xf32, #tpu.memory_space<vmem>>, vector<8x128xf32>
    tpu.vector_store %arg6[%c0_15, %c0_16], %38 {strides = array<i32>} : memref<8x128xf32, #tpu.memory_space<vmem>>, vector<8x128xf32>,
    %cst_17 = arith.constant 0.000000e+00 : f32
    %40 = vector.broadcast %cst_17 : f32 to vector<8x64xf32>
    %41 = tpu.concatenate %32, %30, %40 in 1 : vector<8x32xf32>, vector<8x32xf32>, vector<8x64xf32> -> vector<8x128xf32>
    %c0_18 = arith.constant 0 : index
    %c0_19 = arith.constant 0 : index
    %42 = vector.load %arg7[%c0_18, %c0_19] : memref<8x128xf32, #tpu.memory_space<vmem>>, vector<8x128xf32>
    tpu.vector_store %arg7[%c0_18, %c0_19], %41 {strides = array<i32>} : memref<8x128xf32, #tpu.memory_space<vmem>>, vector<8x128xf32>,
    return
  }
}

</mosaic_0001>

<bundles_post_ra>
// kernel: tpu_custom_call.1
= control target key start
LH: loop header
LB: loop body
LE: loop exit
PB: predicated region body
PF: predicated region fallthrough
CT: control target
= control target key end

     0   :  { %13 = vsyncpa [#allocation3], 0  ;;  %s605_s0 = inlined_call_operand.hbm [shape: f32[8,96], index: 0, kind: input, shape index: {}]   ;;  %s606_s1 = inlined_call_operand.hbm [shape: f32[8,32], index: 1, kind: input, shape index: {}]   ;;  %s607_s2 = inlined_call_operand.hbm [shape: bf16[96,128], index: 2, kind: input, shape index: {}]   ;;  %s608_s3 = inlined_call_operand.vmem [shape: f32[1,128], index: 3, kind: input, shape index: {}]   ;;  %s609_s4 = inlined_call_operand.hbm [shape: bf16[32,128], index: 4, kind: input, shape index: {}]   ;;  %s610_s5 = inlined_call_operand.vmem [shape: f32[1,128], index: 5, kind: input, shape index: {}]   ;;  %s611_s6 = inlined_call_operand.hbm [shape: f32[8,128], index: 6, kind: output, shape index: {0}]   ;;  %s612_s7 = inlined_call_operand.hbm [shape: f32[8,128], index: 7, kind: output, shape index: {1}]  }
   0x1   :  { %14 = vsyncpa [#allocation6], 0 }
   0x2   :  { %15 = vsyncpa [#allocation9], 0 }
   0x3   :  { %16 = vsyncpa [#allocation4], 0 }
   0x4   :  { %17 = vsyncpa [#allocation12], 0  ;;  %s524_s24 = smov [#allocation5]   ;;  %s525_s26 = smov [#allocation2]  }
   0x5   :  { %s34_s25 = sshll.u32 %s524_s24, 4  ;;  %s24_s27 = sshll.u32 %s525_s26, 4  ;;  %s35_s25 = int_to_ptr.vmem [resolvable:$true] %s34_s25  ;;  %s25_s27 = int_to_ptr.vmem [resolvable:$true] %s24_s27 }
   0x6   :  { %s402_s28 = scalar_lea.vmem %s35_s25, 128  ;;  %p407_p1 = scmp.lt.s32.totalorder %s35_s25, %s35_s25 }
   0x7   :  { %p403_p0 = scmp.ne.s32.totalorder %s35_s25, %s402_s28  ;;  %p408_p2 = scmp.lt.s32.totalorder %s402_s28, %s402_s28 }
   0x9   :  { %p409_p3 = por %p408_p2, %p407_p1 }
   0xb   :  { %p410_p4 = pnand %p409_p3, %p403_p0 }
   0xd   :  { %413 = shalt.err (!%p410_p4)
}
   0xe   :  { %37 = dma.hbm_to_vmem [thread:$0]  %s606_s1, 128, %s35_s25, [#allocation6]  }
   0xf   :  { %s422_s8 = scalar_lea.vmem %s25_s27, 128  ;;  %p427_p6 = scmp.lt.s32.totalorder %s25_s27, %s25_s27 }
  0x10   :  { %p423_p5 = scmp.ne.s32.totalorder %s25_s27, %s422_s8  ;;  %p428_p7 = scmp.lt.s32.totalorder %s422_s8, %s422_s8 }
  0x12   :  { %p429_p8 = por %p428_p7, %p427_p6 }
  0x14   :  { %p430_p9 = pnand %p429_p8, %p423_p5 }
  0x16   :  { %433 = shalt.err (!%p430_p9)
}
  0x17   :  { %27 = dma.hbm_to_vmem [thread:$0]  %s605_s0, 128, %s25_s27, [#allocation3]  }
  0x18   :  { %s526_s11 = smov [#allocation7]  }
  0x19   :  { %s43_s12 = sshll.u32 %s526_s11, 4  ;;  %s44_s12 = int_to_ptr.vmem [resolvable:$true] %s43_s12 }
  0x1a   :  { %s442_s13 = scalar_lea.vmem %s44_s12, 768  ;;  %p447_p11 = scmp.lt.s32.totalorder %s44_s12, %s44_s12 }
  0x1b   :  { %p443_p10 = scmp.ne.s32.totalorder %s44_s12, %s442_s13  ;;  %p448_p12 = scmp.lt.s32.totalorder %s442_s13, %s442_s13 }
  0x1d   :  { %p449_p13 = por %p448_p12, %p447_p11 }
  0x1f   :  { %p450_p0 = pnand %p449_p13, %p443_p10 }
  0x21   :  { %453 = shalt.err (!%p450_p0)
}
  0x22   :  { %s527_s1 = smov 64   ;;  %s528_s14 = smov 4  }
  0x23   :  { %49 = dma.hbm_to_vmem [thread:$0]  %s607_s2, 768, %s44_s12, [#allocation6], %s527_s1, %s527_s1, %s528_s14  }
  0x24   :  { %s529_s17 = smov [#allocation8]  }
  0x25   :  { %s57_s0 = sshll.u32 %s529_s17, 4  ;;  %s58_s0 = int_to_ptr.vmem [resolvable:$true] %s57_s0 }
  0x26   :  { %s462_s18 = scalar_lea.vmem %s58_s0, 256  ;;  %p467_p2 = scmp.lt.s32.totalorder %s58_s0, %s58_s0 }
  0x27   :  { %p463_p1 = scmp.ne.s32.totalorder %s58_s0, %s462_s18  ;;  %p468_p3 = scmp.lt.s32.totalorder %s462_s18, %s462_s18 }
  0x29   :  { %p469_p4 = por %p468_p3, %p467_p2 }
  0x2b   :  { %p470_p5 = pnand %p469_p4, %p463_p1 }
  0x2d   :  { %473 = shalt.err (!%p470_p5)
}
  0x2e   :  { %63 = dma.hbm_to_vmem [thread:$0]  %s609_s4, 256, %s58_s0, [#allocation9], %s527_s1, %s527_s1, %s528_s14  }
  0x2f   :  { %514 = dma.done.wait [#allocation3], 128  }
  0x30   :  { %515 = vsyncadd [#allocation3], 4294967168 }
  0x31   :  { %516 = dma.done.wait [#allocation6], 896  }
  0x32   :  { %517 = vsyncadd [#allocation6], 4294966400 }
  0x33   :  { %518 = dma.done.wait [#allocation9], 256  }
  0x34   :  { %519 = vsyncadd [#allocation9], 4294967040  ;;  %v530_v0 = vmov 0.0   ;;  %vm531_vm0 = vmmov 0   ;;  %v378_v1 = vld [vmem:[#allocation7 + $0x28] sm:$0xff]   ;;  %v379_v2 = vld [vmem:[#allocation7 + $0x20] sm:$0xff]  }
  0x35   :  { %343 = vmatprep.subr.bf16.mxu0 %v530_v0  ;;  %355 = vmatprep.mubr.msk.bf16.mxu0 %vm531_vm0, %v530_v0  ;;  %v380_v3 = vld [vmem:[#allocation7 + $0x18] sm:$0xff]   ;;  %v381_v4 = vld [vmem:[#allocation7 + $0x10] sm:$0xff]   ;;  %v382_v5 = vld [vmem:[#allocation7 + $0x8] sm:$0xff]   ;;  %vm136_vm1 = vcmask 785408   ;;  %s532_s21 = smov 32   ;;  %vm236_vm2 = vcmask 261120  }
  0x36   :  { %359 = vmatprep.subr.bf16.mxu1 %v530_v0  ;;  %363 = vmatprep.mubr.msk.bf16.mxu1 %vm531_vm0, %v530_v0  ;;  %v383_v6 = vld [vmem:[#allocation7] sm:$0xff]   ;;  %v79_v7 = vld [vmem:[#allocation2] sm:$0xff]  ;;  %v187_v16 = vld [vmem:[#allocation5] sm:$0xff]  ;;  %vm286_vm3 = vcmask 523264  }
  0x37   :  { %344 = vmatpush3.bf16.msra.mxu0 %v378_v1  ;;  %v80_v8 = vpack.c.bf16 %v79_v7, %v79_v7  ;;  %v320_v9 = vld [vmem:[%s608_s3] ss:$0 sm:$0xff]  ;;  %v384_v27 = vld [vmem:[#allocation8 + $0x8] sm:$0xff]   ;;  %s533_s3 = smov [#allocation11]  }
  0x38   :  { %345 = vmatprep.subr.bf16.mxu0 %v530_v0  ;;  %360 = vmatpush3.bf16.msra.mxu1 %v384_v27  ;;  %v385_v28 = vld [vmem:[#allocation8] sm:$0xff]   ;;  %s305_s22 = sshll.u32 %s533_s3, 4  ;;  %s306_s22 = int_to_ptr.vmem [resolvable:$true] %s305_s22 }
  0x39   :  { %361 = vmatprep.subr.bf16.mxu1 %v530_v0  ;;  %s474_s23 = scalar_lea.vmem %s306_s22, 128  ;;  %p479_p7 = scmp.lt.s32.totalorder %s306_s22, %s306_s22 }
  0x3a   :  { %p475_p6 = scmp.ne.s32.totalorder %s306_s22, %s474_s23  ;;  %p480_p8 = scmp.lt.s32.totalorder %s474_s23, %s474_s23 }
  0x3b   :  { %346 = vmatpush3.bf16.msra.mxu0 %v379_v2 }
  0x3c   :  { %347 = vmatprep.subr.bf16.mxu0 %v530_v0  ;;  %362 = vmatpush3.bf16.msra.mxu1 %v385_v28  ;;  %p481_p9 = por %p480_p8, %p479_p7 }
  0x3e   :  { %p482_p10 = pnand %p481_p9, %p475_p6 }
  0x3f   :  { %348 = vmatpush3.bf16.msra.mxu0 %v380_v3 }
  0x40   :  { %349 = vmatprep.subr.bf16.mxu0 %v530_v0 }
  0x43   :  { %350 = vmatpush3.bf16.msra.mxu0 %v381_v4 }
  0x44   :  { %351 = vmatprep.subr.bf16.mxu0 %v530_v0 }
  0x47   :  { %352 = vmatpush3.bf16.msra.mxu0 %v382_v5 }
  0x48   :  { %353 = vmatprep.subr.bf16.mxu0 %v530_v0 }
  0x4b   :  { %354 = vmatpush3.bf16.msra.mxu0 %v383_v6 }
  0x4e   :  { %356 = vmatmul.mubr.msk.bf16.vlgmr.msra.gmra.mxu0 %vm136_vm1, %v80_v8 }
 0x10e   :  { %v174_v10 = vpop.f32.mrf.mxu0 }
 0x10f   :  { %v175_v11 = vadd.f32 %v320_v9, %v174_v10 }
 0x110   :  { %v357_v12 = vpop.f32.mrf.mxu0 }
 0x111   :  { %386 = vtanh.f32 %v175_v11  ;;  %v328_v17 = vmul.f32 -1.442695, %v175_v11 }
 0x112   :  { %v177_v13 = vpop.f32.mrf.mxu0 }
 0x113   :  { %388 = vpow2.f32 %v328_v17 }
 0x114   :  { %v358_v14 = vpop.f32.mrf.mxu0 }
 0x11e   :  { %v387_v15 = vpop.eup %386 }
 0x11f   :  { %194 = vrot.lane.b32.xlu0 %v387_v15, %s527_s1 }
 0x120   :  { %v389_v18 = vpop.eup %388 }
 0x121   :  { %v183_v19 = vadd.f32 1.0, %v389_v18 }
 0x123   :  { %189 = vrot.lane.b32.xlu0 %v187_v16, %s532_s21  ;;  %390 = vrcp.f32 %v183_v19 }
 0x130   :  { %v391_v20 = vpop.eup %390 }
 0x191   :  { %v195_v21 = vpop.permute.xlu0 %194 }
 0x192   :  { %v197_v22 = vmul.f32 %v391_v20, %v195_v21 }
 0x194   :  { %199 = vrot.lane.b32.xlu1 %v197_v22, %s532_s21 }
 0x195   :  { %v190_v23 = vpop.permute.xlu0 %189 }
 0x196   :  { %v192_v24 = vmul.f32 %v391_v20, %v190_v23 }
 0x206   :  { %v200_v25 = vpop.permute.xlu1 %199 }
 0x207   :  { %v202_v26 = vadd.f32 %v200_v25, %v192_v24 }
 0x209   :  { %392 = vtanh.f32 %v202_v26 }
 0x216   :  { %v393_v29 = vpop.eup %392 }
 0x217   :  { %205 = vrot.lane.b32.xlu1 %v393_v29, %s527_s1 }
 0x289   :  { %v206_v30 = vpop.permute.xlu1 %205 }
 0x28a   :  { %v208_v31 = vmul.f32 %v391_v20, %v206_v30 }
 0x28c   :  { %v209_v32 = vpack.c.bf16 %v208_v31, %v208_v31  ;;  %282 = vrot.lane.b32.xlu1 %v208_v31, %s532_s21 }
 0x28e   :  { %222 = vrot.lane.b32.xlu0 %v209_v32, %s532_s21 }
 0x2fe   :  { %v283_v33 = vpop.permute.xlu1 %282 }
 0x2ff   :  { %v285_v34 = vsel %vm236_vm2, %v283_v33, %v202_v26 }
 0x300   :  { %v223_v35 = vpop.permute.xlu0 %222  ;;  %v287_v36 = vsel %vm286_vm3, %v285_v34, 0.0 }
 0x301   :  { %364 = vmatmul.mubr.msk.bf16.vlgmr.msra.gmra.mxu1 %vm236_vm2, %v223_v35  ;;  %288 = vst [vmem:[#allocation11] sm:$0xff] %v287_v36 }
 0x302   :  { %485 = shalt.err (!%p482_p10)
}
 0x303   :  { %308 = dma.vmem_to_hbm [thread:$0]  %s306_s22, 128, %s612_s7, [#allocation12]   ;;  %v329_v37 = vld [vmem:[%s610_s5] ss:$0 sm:$0xff] }
 0x304   :  { %s534_s28 = smov [#allocation10]  }
 0x305   :  { %s295_s29 = sshll.u32 %s534_s28, 4  ;;  %s296_s29 = int_to_ptr.vmem [resolvable:$true] %s295_s29 }
 0x306   :  { %s494_s30 = scalar_lea.vmem %s296_s29, 128  ;;  %p499_p12 = scmp.lt.s32.totalorder %s296_s29, %s296_s29 }
 0x307   :  { %p495_p11 = scmp.ne.s32.totalorder %s296_s29, %s494_s30  ;;  %p500_p13 = scmp.lt.s32.totalorder %s494_s30, %s494_s30 }
 0x309   :  { %p501_p0 = por %p500_p13, %p499_p12 }
 0x30b   :  { %p502_p1 = pnand %p501_p0, %p495_p11 }
 0x3c1   :  { %v274_v38 = vpop.f32.mrf.mxu1 }
 0x3c2   :  { %v275_v39 = vadd.f32 %v329_v37, %v274_v38 }
 0x3c3   :  { %v365_v40 = vpop.f32.mrf.mxu1 }
 0x3c4   :  { %280 = vst [vmem:[#allocation10] sm:$0xff] %v275_v39 }
 0x3c5   :  { %v277_v41 = vpop.f32.mrf.mxu1 }
 0x3c6   :  { %505 = shalt.err (!%p502_p1)
}
 0x3c7   :  { %298 = dma.vmem_to_hbm [thread:$0]  %s296_s29, 128, %s611_s6, [#allocation4]   ;;  %v366_v42 = vpop.f32.mrf.mxu1 }
 0x3c8   :  { %520 = dma.done.wait [#allocation4], 128  }
 0x3c9   :  { %521 = vsyncadd [#allocation4], 4294967168 }
 0x3ca   :  { %522 = dma.done.wait [#allocation12], 128  }
 0x3cb   :  { %523 = vsyncadd [#allocation12], 4294967168 }
 0x3cc   :  { %315 = vsyncpa [#allocation3], 1 }
 0x3cd   :  { %316 = vsyncpa [#allocation6], 1 }
 0x3ce   :  { %317 = vsyncpa [#allocation9], 1 }
 0x3cf   :  { %318 = vsyncpa [#allocation4], 1 }
 0x3d0   :  { %319 = vsyncpa [#allocation12], 1 }

</bundles_post_ra>
